<compile_context>
chip_gen: v5e
topology: v5e:2x2
jax: 0.10.0
libtpu: 0.0.40
codegen_flags: <defaults>
</compile_context>

<pallas_src>
import functools

import numpy as np
import jax
import jax.numpy as jnp
from jax import lax
from jax.experimental import pallas as pl
from jax.experimental.pallas import tpu as pltpu

EPS = 1e-6          # matches partial(nn.BatchNorm2d, eps=1e-06)
LANE = 128          # lane width: all channel dims padded to a multiple of this
TM_MATMUL = 512     # row tile for the matmul+stats kernel
TM_EW = 512         # row tile for the BN/ReLU epilogue kernels
TK_CAP = 512        # max K tile for the matmul kernel


# ------------------------------- small helpers -------------------------------

def _rup(x, m):
    return ((x + m - 1) // m) * m


def _pad_to(a, size, axis):
    """Zero-pad `a` along `axis` up to `size`."""
    pad = size - a.shape[axis]
    if pad <= 0:
        return a
    widths = [(0, 0)] * a.ndim
    widths[axis] = (0, pad)
    return jnp.pad(a, widths)


def _choose_tk(k_dim, cap=TK_CAP):
    """Largest divisor of k_dim that is a multiple of LANE and <= cap."""
    m = k_dim // LANE
    best = 1
    for d in range(1, min(m, cap // LANE) + 1):
        if m % d == 0:
            best = d
    return LANE * best


# ------------------------------- Pallas kernels -------------------------------

def _matmul_stats_kernel(x_ref, w_ref, y_ref, sum_ref, sq_ref):
    """y[i] += x[i,k] @ w[k]  (bf16 MXU, f32 accum); at the last K step accumulate
    per-column sum / sum-of-squares of the finished row tile into grid-resident outputs."""
    i = pl.program_id(0)
    k = pl.program_id(1)
    nk = pl.num_programs(1)

    @pl.when(k == 0)
    def _():
        y_ref[...] = jnp.zeros_like(y_ref)

    y_ref[...] += jnp.dot(x_ref[...].astype(jnp.bfloat16),
                          w_ref[...].astype(jnp.bfloat16),
                          preferred_element_type=jnp.float32)

    @pl.when((i == 0) & (k == 0))
    def _():
        sum_ref[...] = jnp.zeros_like(sum_ref)
        sq_ref[...] = jnp.zeros_like(sq_ref)

    @pl.when(k == nk - 1)
    def _():
        y = y_ref[...]
        sum_ref[...] += jnp.sum(y, axis=0, keepdims=True)
        sq_ref[...] += jnp.sum(y * y, axis=0, keepdims=True)


def _conv3x3_s1_kernel(x_ref, w_ref, y_ref, sum_ref, sq_ref, *, hw, w_img):
    """Fused 3x3 stride-1 (pad 1) conv for one batch image.

    x_ref: (hw + 2*w_img + 2, C)   H-zero-padded, W-flattened image (one leading/trailing
                                   extra zero row absorbs the corner taps).
    w_ref: (9, C, C)               HWIO weight reshaped to (kh*3+kw, cin, cout).
    The 9 taps are shifted slices of the flat image; taps with kw==0 / kw==2 wrap around
    the image width, so those rows are masked to zero before the matmul.
    """
    b = pl.program_id(0)

    col = lax.broadcasted_iota(jnp.int32, (hw, 1), 0) % w_img
    mask_l = (col > 0).astype(jnp.float32)           # zero out wo == 0        (kw == 0)
    mask_r = (col < (w_img - 1)).astype(jnp.float32)  # zero out wo == W - 1   (kw == 2)

    y_ref[...] = jnp.zeros_like(y_ref)
    for kh in range(3):
        for kw in range(3):
            start = (w_img + 1) + (kh - 1) * w_img + (kw - 1)
            tap = x_ref[pl.ds(start, hw), :]
            if kw == 0:
                tap = tap * mask_l
            elif kw == 2:
                tap = tap * mask_r
            y_ref[...] += jnp.dot(tap.astype(jnp.bfloat16),
                                  w_ref[kh * 3 + kw].astype(jnp.bfloat16),
                                  preferred_element_type=jnp.float32)

    y = y_ref[...]
    psum = jnp.sum(y, axis=0, keepdims=True)
    psq = jnp.sum(y * y, axis=0, keepdims=True)

    @pl.when(b == 0)
    def _():
        sum_ref[...] = jnp.zeros_like(sum_ref)
        sq_ref[...] = jnp.zeros_like(sq_ref)

    sum_ref[...] += psum
    sq_ref[...] += psq


# BN epilogues: scale/shift are the pre-folded BatchNorm affine (host-side (1,C) math).
def _bn_relu_kernel(y_ref, sc_ref, sh_ref, o_ref):
    o_ref[...] = jnp.maximum(y_ref[...] * sc_ref[...] + sh_ref[...], 0.0)


def _bn_relu_add_kernel(y_ref, a_ref, sc_ref, sh_ref, o_ref):
    # act1(bn1(conv1(x))) + x_t
    o_ref[...] = jnp.maximum(y_ref[...] * sc_ref[...] + sh_ref[...], 0.0) + a_ref[...]


def _bn_bn_add_relu_kernel(y_ref, r_ref, sc_ref, sh_ref, rsc_ref, rsh_ref, o_ref):
    # relu(bn3(conv3) + residual_bn(residual_conv))
    o_ref[...] = jnp.maximum(y_ref[...] * sc_ref[...] + sh_ref[...]
                             + r_ref[...] * rsc_ref[...] + rsh_ref[...], 0.0)


def _bn_add_res_relu_kernel(y_ref, r_ref, sc_ref, sh_ref, o_ref):
    # relu(bn3(conv3) + identity residual)
    o_ref[...] = jnp.maximum(y_ref[...] * sc_ref[...] + sh_ref[...] + r_ref[...], 0.0)


# ------------------------------- kernel wrappers -------------------------------

def _matmul_stats(x, w):
    """x: (rows, K) f32, w: (K, C) f32 with K, C multiples of 128.
    Returns y (rows, C) f32, col_sum (1, C), col_sumsq (1, C).
    Padded rows are zero, so the sums equal sums over the true rows."""
    rows, k_dim = x.shape
    _, c_dim = w.shape
    tm = min(TM_MATMUL, _rup(rows, 8))
    rows_p = _rup(rows, tm)
    x_p = _pad_to(x, rows_p, 0)
    tk = _choose_tk(k_dim)
    grid = (rows_p // tm, k_dim // tk)

    y, ssum, ssq = pl.pallas_call(
        _matmul_stats_kernel,
        grid_spec=pltpu.PrefetchScalarGridSpec(
            num_scalar_prefetch=0,
            grid=grid,
            in_specs=[
                pl.BlockSpec((tm, tk), lambda i, k: (i, k)),
                pl.BlockSpec((tk, c_dim), lambda i, k: (k, 0)),
            ],
            out_specs=[
                pl.BlockSpec((tm, c_dim), lambda i, k: (i, 0)),
                pl.BlockSpec((1, c_dim), lambda i, k: (0, 0)),
                pl.BlockSpec((1, c_dim), lambda i, k: (0, 0)),
            ]),
        out_shape=(
            jax.ShapeDtypeStruct((rows_p, c_dim), jnp.float32),
            jax.ShapeDtypeStruct((1, c_dim), jnp.float32),
            jax.ShapeDtypeStruct((1, c_dim), jnp.float32),
        ),
        compiler_params=pltpu.CompilerParams(
            dimension_semantics=("arbitrary", "arbitrary")),
        cost_estimate=pl.CostEstimate(
            flops=2 * rows_p * k_dim * c_dim,
            transcendentals=0,
            bytes_accessed=4 * (rows_p * k_dim + k_dim * c_dim + rows_p * c_dim)),
    )(x_p, w)
    return y[:rows], ssum, ssq


def _conv3x3_s1_stats(xflat, w9, hw, w_img):
    """Fused 3x3 stride-1 conv + column stats. xflat: (B, hw + 2*w_img + 2, C)."""
    bsz, l_dim, c_dim = xflat.shape
    kern = functools.partial(_conv3x3_s1_kernel, hw=hw, w_img=w_img)
    y, ssum, ssq = pl.pallas_call(
        kern,
        grid_spec=pltpu.PrefetchScalarGridSpec(
            num_scalar_prefetch=0,
            grid=(bsz,),
            in_specs=[
                pl.BlockSpec((None, l_dim, c_dim), lambda b: (b, 0, 0)),
                pl.BlockSpec((9, c_dim, c_dim), lambda b: (0, 0, 0)),
            ],
            out_specs=[
                pl.BlockSpec((None, hw, c_dim), lambda b: (b, 0, 0)),
                pl.BlockSpec((1, c_dim), lambda b: (0, 0)),
                pl.BlockSpec((1, c_dim), lambda b: (0, 0)),
            ]),
        out_shape=(
            jax.ShapeDtypeStruct((bsz, hw, c_dim), jnp.float32),
            jax.ShapeDtypeStruct((1, c_dim), jnp.float32),
            jax.ShapeDtypeStruct((1, c_dim), jnp.float32),
        ),
        compiler_params=pltpu.CompilerParams(dimension_semantics=("arbitrary",)),
        cost_estimate=pl.CostEstimate(
            flops=2 * bsz * hw * 9 * c_dim * c_dim,
            transcendentals=0,
            bytes_accessed=4 * (bsz * l_dim * c_dim + 9 * c_dim * c_dim
                                + bsz * hw * c_dim)),
    )(xflat, w9)
    return y, ssum, ssq


def _bn_apply(kernel, row_ins, vec_ins):
    """Row-tiled elementwise epilogue: kernel(row_refs..., vec_refs..., out_ref)."""
    rows, c_dim = row_ins[0].shape
    tm = min(TM_EW, _rup(rows, 8))
    rows_p = _rup(rows, tm)
    row_ins = [_pad_to(a, rows_p, 0) for a in row_ins]
    out = pl.pallas_call(
        kernel,
        grid_spec=pltpu.PrefetchScalarGridSpec(
            num_scalar_prefetch=0,
            grid=(rows_p // tm,),
            in_specs=(
                [pl.BlockSpec((tm, c_dim), lambda i: (i, 0))] * len(row_ins)
                + [pl.BlockSpec((1, c_dim), lambda i: (0, 0))] * len(vec_ins)),
            out_specs=pl.BlockSpec((tm, c_dim), lambda i: (i, 0))),
        out_shape=jax.ShapeDtypeStruct((rows_p, c_dim), jnp.float32),
        compiler_params=pltpu.CompilerParams(dimension_semantics=("parallel",)),
    )(*row_ins, *vec_ins)
    return out[:rows]


def _bn_scale_shift(col_sum, col_sq, count, gamma_p, beta_p):
    """Fold training-mode BN (batch mean/biased var) into per-channel scale/shift."""
    mean = col_sum / count
    var = jnp.maximum(col_sq / count - mean * mean, 0.0)
    scale = gamma_p * lax.rsqrt(var + EPS)
    shift = beta_p - mean * scale
    return scale, shift


# ------------------------------- module wrapper -------------------------------

class ConvBlockPallas:
    """Pallas-TPU forward of Conformer's ConvBlock (training-mode BatchNorm, eps=1e-6)."""

    def __init__(self, inplanes, outplanes, stride=1, res_conv=False, groups=1,
                 key=jax.random.PRNGKey(0)):
        assert groups == 1  # TODO(synk): grouped 3x3 conv not implemented (module default groups=1)
        expansion = 4
        med = outplanes // expansion
        self.inplanes, self.outplanes, self.med = inplanes, outplanes, med
        self.stride, self.res_conv = stride, res_conv
        self.cin_p = _rup(inplanes, LANE)
        self.med_p = _rup(med, LANE)
        self.cout_p = _rup(outplanes, LANE)

        ks = jax.random.split(key, 12)
        f32 = jnp.float32
        # true-shape params (also used by the pure-JAX reference)
        self.w1 = (0.1 * jax.random.normal(ks[0], (inplanes, med))).astype(f32)
        self.w2 = (0.1 * jax.random.normal(ks[1], (3, 3, med, med))).astype(f32)  # HWIO
        self.w3 = (0.1 * jax.random.normal(ks[2], (med, outplanes))).astype(f32)
        self.g1 = (1.0 + 0.1 * jax.random.normal(ks[3], (1, med))).astype(f32)
        self.b1 = (0.1 * jax.random.normal(ks[4], (1, med))).astype(f32)
        self.g2 = (1.0 + 0.1 * jax.random.normal(ks[5], (1, med))).astype(f32)
        self.b2 = (0.1 * jax.random.normal(ks[6], (1, med))).astype(f32)
        self.g3 = (1.0 + 0.1 * jax.random.normal(ks[7], (1, outplanes))).astype(f32)
        self.b3 = (0.1 * jax.random.normal(ks[8], (1, outplanes))).astype(f32)
        if res_conv:
            self.wr = (0.1 * jax.random.normal(ks[9], (inplanes, outplanes))).astype(f32)
            self.gr = (1.0 + 0.1 * jax.random.normal(ks[10], (1, outplanes))).astype(f32)
            self.br = (0.1 * jax.random.normal(ks[11], (1, outplanes))).astype(f32)

        # lane-padded (multiple-of-128) copies for the kernels; extra rows/cols are zero
        cin_p, med_p, cout_p = self.cin_p, self.med_p, self.cout_p
        self.w1_p = _pad_to(_pad_to(self.w1, cin_p, 0), med_p, 1)
        w2_p = jnp.pad(self.w2, ((0, 0), (0, 0), (0, med_p - med), (0, med_p - med)))
        self.w2_p9 = w2_p.reshape(9, med_p, med_p)
        self.w2_pflat = w2_p.reshape(9 * med_p, med_p)
        self.w3_p = _pad_to(_pad_to(self.w3, med_p, 0), cout_p, 1)
        self.g1_p = _pad_to(self.g1, med_p, 1)
        self.b1_p = _pad_to(self.b1, med_p, 1)
        self.g2_p = _pad_to(self.g2, med_p, 1)
        self.b2_p = _pad_to(self.b2, med_p, 1)
        self.g3_p = _pad_to(self.g3, cout_p, 1)
        self.b3_p = _pad_to(self.b3, cout_p, 1)
        if res_conv:
            self.wr_p = _pad_to(_pad_to(self.wr, cin_p, 0), cout_p, 1)
            self.gr_p = _pad_to(self.gr, cout_p, 1)
            self.br_p = _pad_to(self.br, cout_p, 1)

    def __call__(self, x, x_t=None, return_x_2=True):
        # x: (B, H, W, Cin) f32 NHWC; x_t: optional (B, H, W, med) f32
        B, H, W, Cin = x.shape
        assert Cin == self.inplanes
        s = self.stride
        Ho = (H - 1) // s + 1
        Wo = (W - 1) // s + 1
        med, Cout = self.med, self.outplanes
        cin_p, med_p, cout_p = self.cin_p, self.med_p, self.cout_p
        f32 = jnp.float32

        rows1 = B * H * W
        rows2 = B * Ho * Wo

        xf = _pad_to(x.reshape(rows1, Cin).astype(f32), cin_p, 1)

        # ---- conv1 (1x1) + bn1 + act1 (+ x_t) ----
        y1, s1, q1 = _matmul_stats(xf, self.w1_p)
        sc1, sh1 = _bn_scale_shift(s1, q1, float(rows1), self.g1_p, self.b1_p)
        if x_t is None:
            x1 = _bn_apply(_bn_relu_kernel, [y1], [sc1, sh1])
        else:
            xtf = _pad_to(x_t.reshape(rows1, med).astype(f32), med_p, 1)
            x1 = _bn_apply(_bn_relu_add_kernel, [y1, xtf], [sc1, sh1])
        x1_img = x1.reshape(B, H, W, med_p)

        # ---- conv2 (3x3, stride s, pad 1) + bn2 + act2 -> x2 ----
        if s == 1:
            hw = H * W
            zpad = jnp.zeros((B, W + 1, med_p), f32)
            xflat = jnp.concatenate([zpad, x1_img.reshape(B, hw, med_p), zpad], axis=1)
            y2, s2, q2 = _conv3x3_s1_stats(xflat, self.w2_p9, hw, W)
            y2 = y2.reshape(rows2, med_p)
        else:
            # TODO(synk): stride>1 3x3 conv still builds an im2col buffer in glue
            # (halo'd strided input blocks are not expressible with plain BlockSpecs).
            xp = jnp.pad(x1_img, ((0, 0), (1, 1), (1, 1), (0, 0)))
            taps = [xp[:, kh:kh + (Ho - 1) * s + 1:s, kw:kw + (Wo - 1) * s + 1:s, :]
                    for kh in range(3) for kw in range(3)]
            cols = jnp.stack(taps, axis=3).reshape(rows2, 9 * med_p)
            y2, s2, q2 = _matmul_stats(cols, self.w2_pflat)
        sc2, sh2 = _bn_scale_shift(s2, q2, float(rows2), self.g2_p, self.b2_p)
        x2 = _bn_apply(_bn_relu_kernel, [y2], [sc2, sh2])

        # ---- conv3 (1x1) + bn3 + residual + act3 ----
        y3, s3, q3 = _matmul_stats(x2, self.w3_p)
        sc3, sh3 = _bn_scale_shift(s3, q3, float(rows2), self.g3_p, self.b3_p)

        if self.res_conv:
            if s == 1:
                xr = xf  # reuse the already-padded flattened input (no extra HBM copy)
            else:
                xr = _pad_to(x[:, ::s, ::s, :].reshape(rows2, Cin).astype(f32), cin_p, 1)
            yr, sr, qr = _matmul_stats(xr, self.wr_p)
            scr, shr = _bn_scale_shift(sr, qr, float(rows2), self.gr_p, self.br_p)
            outf = _bn_apply(_bn_bn_add_relu_kernel, [y3, yr], [sc3, sh3, scr, shr])
        else:
            assert Cin == Cout and s == 1, "identity residual requires matching shapes"
            outf = _bn_apply(_bn_add_res_relu_kernel, [y3, xf], [sc3, sh3])

        out = outf[:, :Cout].reshape(B, Ho, Wo, Cout)
        if return_x_2:
            return out, x2[:, :med].reshape(B, Ho, Wo, med)
        return out


# ------------------------------- pure-JAX reference -------------------------------

def _bn_ref(x, gamma, beta):
    mean = jnp.mean(x, axis=(0, 1, 2), keepdims=True)
    var = jnp.mean((x - mean) ** 2, axis=(0, 1, 2), keepdims=True)
    return ((x - mean) * lax.rsqrt(var + EPS) * gamma.reshape(1, 1, 1, -1)
            + beta.reshape(1, 1, 1, -1))


def _conv_ref(x, w, stride, pad):
    # bf16 inputs / f32 accumulation, mirroring the kernels' MXU precision
    return lax.conv_general_dilated(
        x.astype(jnp.bfloat16), w.astype(jnp.bfloat16),
        window_strides=(stride, stride), padding=((pad, pad), (pad, pad)),
        dimension_numbers=("NHWC", "HWIO", "NHWC"),
        preferred_element_type=jnp.float32)


def conv_block_ref(m: ConvBlockPallas, x, x_t=None):
    x1 = jnp.maximum(_bn_ref(_conv_ref(x, m.w1[None, None], 1, 0), m.g1, m.b1), 0.0)
    if x_t is not None:
        x1 = x1 + x_t
    x2 = jnp.maximum(_bn_ref(_conv_ref(x1, m.w2, m.stride, 1), m.g2, m.b2), 0.0)
    y = _bn_ref(_conv_ref(x2, m.w3[None, None], 1, 0), m.g3, m.b3)
    if m.res_conv:
        r = _bn_ref(_conv_ref(x, m.wr[None, None], m.stride, 0), m.gr, m.br)
    else:
        r = x
    return jnp.maximum(y + r, 0.0), x2


# ----------------------------------- main -----------------------------------

if __name__ == "__main__":
    key = jax.random.PRNGKey(0)

    configs = [
        # stage-entry style block: res_conv branch, stride 1, fused 3x3 kernel
        dict(B=2, H=20, W=20, cin=4, cout=16, stride=1, res_conv=True, with_xt=False),
        # fusion_block style: identity residual + x_t add, stride 1
        dict(B=2, H=20, W=20, cin=16, cout=16, stride=1, res_conv=False, with_xt=True),
        # down-sampling block: stride 2, res_conv branch (im2col fallback path)
        dict(B=2, H=16, W=16, cin=16, cout=32, stride=2, res_conv=True, with_xt=False),
    ]

    for cfg in configs:
        key, kx, kt, kp = jax.random.split(key, 4)
        block = ConvBlockPallas(cfg["cin"], cfg["cout"], stride=cfg["stride"],
                                res_conv=cfg["res_conv"], key=kp)
        x = jax.random.normal(kx, (cfg["B"], cfg["H"], cfg["W"], cfg["cin"]),
                              dtype=jnp.float32)
        x_t = None
        if cfg["with_xt"]:
            x_t = jax.random.normal(kt, (cfg["B"], cfg["H"], cfg["W"], block.med),
                                    dtype=jnp.float32)

        out, x2 = block(x, x_t=x_t, return_x_2=True)
        out = jax.block_until_ready(out)
        x2 = jax.block_until_ready(x2)

        ref_out, ref_x2 = conv_block_ref(block, x, x_t)
        np.testing.assert_allclose(np.asarray(x2), np.asarray(ref_x2),
                                   rtol=2e-3, atol=2e-3)
        np.testing.assert_allclose(np.asarray(out), np.asarray(ref_out),
                                   rtol=2e-3, atol=2e-3)

    print("KERNEL_OK")
</pallas_src>

<mosaic_0001>
module attributes {stable_mosaic.version = 11 : i64} {
  func.func @_matmul_stats_kernel(%arg0: i32, %arg1: i32, %arg2: memref<512x128xf32, #tpu.memory_space<vmem>>, %arg3: memref<128x128xf32, #tpu.memory_space<vmem>>, %arg4: memref<512x128xf32, #tpu.memory_space<vmem>>, %arg5: memref<1x128xf32, #tpu.memory_space<vmem>>, %arg6: memref<1x128xf32, #tpu.memory_space<vmem>>) attributes {dimension_semantics = [#tpu.dimension_semantics<arbitrary>, #tpu.dimension_semantics<arbitrary>], iteration_bounds = array<i64: 2, 1>, scalar_prefetch = 0 : i64, scratch_operands = 0 : i64, tpu.core_type = #tpu.core_type<tc>, window_params = [{transform_indices = @transform_0, window_bounds = array<i64: 512, 128>}, {transform_indices = @transform_1, window_bounds = array<i64: 128, 128>}, {transform_indices = @transform_2, window_bounds = array<i64: 512, 128>}, {pipeline_mode = #tpu.pipeline_mode<synchronous>, transform_indices = @transform_3, window_bounds = array<i64: 1, 128>}, {pipeline_mode = #tpu.pipeline_mode<synchronous>, transform_indices = @transform_4, window_bounds = array<i64: 1, 128>}]} {
    %c0_i32 = arith.constant 0 : i32
    %0 = arith.cmpi eq, %arg1, %c0_i32 : i32
    %1 = arith.extui %0 : i1 to i32
    %c0_i32_0 = arith.constant 0 : i32
    %2 = arith.cmpi ne, %1, %c0_i32_0 : i32
    scf.if %2 {
      %cst_13 = arith.constant 0.000000e+00 : f32
      %19 = vector.broadcast %cst_13 : f32 to vector<512x128xf32>
      %c0_14 = arith.constant 0 : index
      %c0_15 = arith.constant 0 : index
      %20 = vector.load %arg4[%c0_14, %c0_15] : memref<512x128xf32, #tpu.memory_space<vmem>>, vector<512x128xf32>
      tpu.vector_store %arg4[%c0_14, %c0_15], %19 {strides = array<i32>} : memref<512x128xf32, #tpu.memory_space<vmem>>, vector<512x128xf32>,
    } else {
    }
    %c0 = arith.constant 0 : index
    %c0_1 = arith.constant 0 : index
    %3 = vector.load %arg4[%c0, %c0_1] : memref<512x128xf32, #tpu.memory_space<vmem>>, vector<512x128xf32>
    %c0_2 = arith.constant 0 : index
    %c0_3 = arith.constant 0 : index
    %4 = vector.load %arg2[%c0_2, %c0_3] : memref<512x128xf32, #tpu.memory_space<vmem>>, vector<512x128xf32>
    %5 = arith.truncf %4 : vector<512x128xf32> to vector<512x128xbf16>
    %c0_4 = arith.constant 0 : index
    %c0_5 = arith.constant 0 : index
    %6 = vector.load %arg3[%c0_4, %c0_5] : memref<128x128xf32, #tpu.memory_space<vmem>>, vector<128x128xf32>
    %7 = arith.truncf %6 : vector<128x128xf32> to vector<128x128xbf16>
    %cst = arith.constant dense<0.000000e+00> : vector<512x128xf32>
    %8 = tpu.matmul %5, %7, %cst {dimension_numbers = #tpu.dot_dimension_numbers<[1], [0], [0], [1], [0, 0, 1, 1], [], []>} : vector<512x128xbf16>, vector<128x128xbf16>, vector<512x128xf32> -> vector<512x128xf32>
    %9 = arith.addf %3, %8 : vector<512x128xf32>
    %c0_6 = arith.constant 0 : index
    %c0_7 = arith.constant 0 : index
    %10 = vector.load %arg4[%c0_6, %c0_7] : memref<512x128xf32, #tpu.memory_space<vmem>>, vector<512x128xf32>
    tpu.vector_store %arg4[%c0_6, %c0_7], %9 {strides = array<i32>} : memref<512x128xf32, #tpu.memory_space<vmem>>, vector<512x128xf32>,
    %c0_i32_8 = arith.constant 0 : i32
    %11 = arith.cmpi eq, %arg0, %c0_i32_8 : i32
    %c0_i32_9 = arith.constant 0 : i32
    %12 = arith.cmpi eq, %arg1, %c0_i32_9 : i32
    %13 = arith.andi %11, %12 : i1
    %14 = arith.extui %13 : i1 to i32
    %c0_i32_10 = arith.constant 0 : i32
    %15 = arith.cmpi ne, %14, %c0_i32_10 : i32
    scf.if %15 {
      %cst_13 = arith.constant 0.000000e+00 : f32
      %19 = vector.broadcast %cst_13 : f32 to vector<1x128xf32>
      %c0_14 = arith.constant 0 : index
      %c0_15 = arith.constant 0 : index
      %20 = vector.load %arg5[%c0_14, %c0_15] : memref<1x128xf32, #tpu.memory_space<vmem>>, vector<1x128xf32>
      tpu.vector_store %arg5[%c0_14, %c0_15], %19 {strides = array<i32>} : memref<1x128xf32, #tpu.memory_space<vmem>>, vector<1x128xf32>,
      %cst_16 = arith.constant 0.000000e+00 : f32
      %21 = vector.broadcast %cst_16 : f32 to vector<1x128xf32>
      %c0_17 = arith.constant 0 : index
      %c0_18 = arith.constant 0 : index
      %22 = vector.load %arg6[%c0_17, %c0_18] : memref<1x128xf32, #tpu.memory_space<vmem>>, vector<1x128xf32>
      tpu.vector_store %arg6[%c0_17, %c0_18], %21 {strides = array<i32>} : memref<1x128xf32, #tpu.memory_space<vmem>>, vector<1x128xf32>,
    } else {
    }
    %c0_i32_11 = arith.constant 0 : i32
    %16 = arith.cmpi eq, %arg1, %c0_i32_11 : i32
    %17 = arith.extui %16 : i1 to i32
    %c0_i32_12 = arith.constant 0 : i32
    %18 = arith.cmpi ne, %17, %c0_i32_12 : i32
    scf.if %18 {
      %c0_13 = arith.constant 0 : index
      %c0_14 = arith.constant 0 : index
      %19 = vector.load %arg4[%c0_13, %c0_14] : memref<512x128xf32, #tpu.memory_space<vmem>>, vector<512x128xf32>
      %c0_15 = arith.constant 0 : index
      %c0_16 = arith.constant 0 : index
      %20 = vector.load %arg5[%c0_15, %c0_16] : memref<1x128xf32, #tpu.memory_space<vmem>>, vector<1x128xf32>
      %cst_17 = arith.constant dense<0.000000e+00> : vector<128xf32>
      %21 = vector.multi_reduction <add>, %19, %cst_17 [0] : vector<512x128xf32> to vector<128xf32>
      %22 = vector.shape_cast %21 : vector<128xf32> to vector<1x128xf32>
      %23 = arith.addf %20, %22 : vector<1x128xf32>
      %c0_18 = arith.constant 0 : index
      %c0_19 = arith.constant 0 : index
      %24 = vector.load %arg5[%c0_18, %c0_19] : memref<1x128xf32, #tpu.memory_space<vmem>>, vector<1x128xf32>
      tpu.vector_store %arg5[%c0_18, %c0_19], %23 {strides = array<i32>} : memref<1x128xf32, #tpu.memory_space<vmem>>, vector<1x128xf32>,
      %c0_20 = arith.constant 0 : index
      %c0_21 = arith.constant 0 : index
      %25 = vector.load %arg6[%c0_20, %c0_21] : memref<1x128xf32, #tpu.memory_space<vmem>>, vector<1x128xf32>
      %26 = arith.mulf %19, %19 : vector<512x128xf32>
      %cst_22 = arith.constant dense<0.000000e+00> : vector<128xf32>
      %27 = vector.multi_reduction <add>, %26, %cst_22 [0] : vector<512x128xf32> to vector<128xf32>
      %28 = vector.shape_cast %27 : vector<128xf32> to vector<1x128xf32>
      %29 = arith.addf %25, %28 : vector<1x128xf32>
      %c0_23 = arith.constant 0 : index
      %c0_24 = arith.constant 0 : index
      %30 = vector.load %arg6[%c0_23, %c0_24] : memref<1x128xf32, #tpu.memory_space<vmem>>, vector<1x128xf32>
      tpu.vector_store %arg6[%c0_23, %c0_24], %29 {strides = array<i32>} : memref<1x128xf32, #tpu.memory_space<vmem>>, vector<1x128xf32>,
    } else {
    }
    return
  }
  func.func @transform_0(%arg0: i32, %arg1: i32) -> (i32, i32) {
    %c0_i32 = arith.constant 0 : i32
    return %arg0, %arg1 : i32, i32
  }
  func.func @transform_1(%arg0: i32, %arg1: i32) -> (i32, i32) {
    %c0_i32 = arith.constant 0 : i32
    %c0_i32_0 = arith.constant 0 : i32
    return %arg1, %c0_i32 : i32, i32
  }
  func.func @transform_2(%arg0: i32, %arg1: i32) -> (i32, i32) {
    %c0_i32 = arith.constant 0 : i32
    %c0_i32_0 = arith.constant 0 : i32
    return %arg0, %c0_i32 : i32, i32
  }
  func.func @transform_3(%arg0: i32, %arg1: i32) -> (i32, i32) {
    %c0_i32 = arith.constant 0 : i32
    %c0_i32_0 = arith.constant 0 : i32
    %c0_i32_1 = arith.constant 0 : i32
    return %c0_i32, %c0_i32_0 : i32, i32
  }
  func.func @transform_4(%arg0: i32, %arg1: i32) -> (i32, i32) {
    %c0_i32 = arith.constant 0 : i32
    %c0_i32_0 = arith.constant 0 : i32
    %c0_i32_1 = arith.constant 0 : i32
    return %c0_i32, %c0_i32_0 : i32, i32
  }
}

</mosaic_0001>

<bundles_post_ra>
// kernel: tpu_custom_call.1
= control target key start
LH: loop header
LB: loop body
LE: loop exit
PB: predicated region body
PF: predicated region fallthrough
CT: control target
= control target key end

     0   :  { %s2005_s0 = inlined_call_operand.hbm [shape: f32[1024,128], index: 0, kind: input, shape index: {}]   ;;  %s2006_s1 = inlined_call_operand.hbm [shape: f32[128,128], index: 1, kind: input, shape index: {}]   ;;  %s2007_s2 = inlined_call_operand.hbm [shape: f32[1024,128], index: 2, kind: output, shape index: {0}]   ;;  %s2008_s3 = inlined_call_operand.hbm [shape: f32[1,128], index: 3, kind: output, shape index: {1}]   ;;  %s2009_s4 = inlined_call_operand.hbm [shape: f32[1,128], index: 4, kind: output, shape index: {2}]  }
   0x1   :  { %2015 = sst [smem:[#allocation17_spill]] %s2006_s1 }
   0x2   :  { %10 = vsyncpa [#allocation3], 0 }
   0x3   :  { %12 = vsyncpa [#allocation3 + $0x1], 0 }
   0x4   :  { %13 = vsyncpa [#allocation6], 0 }
   0x5   :  { %14 = vsyncpa [#allocation4], 0 }
   0x6   :  { %16 = vsyncpa [#allocation4 + $0x1], 0 }
   0x7   :  { %17 = vsyncpa [#allocation9], 0  ;;  %s1629_s15 = smov 0   ;;  %s1631_s16 = smov 0  }
   0x8   :  { %s1633_s17 = smov 0   ;;  %s1635_s18 = smov 0  }
   0x9   :  { %s1637_s19 = smov 0   ;;  %s1639_s20 = smov 0  }
   0xa LB: > { %2016 = sst [smem:[#allocation15_spill]] %s1594_s20  ;;  %s1246_s21 = sadd.s32 4294967295, %s1594_s20   ;;  %s1594_s20 = sphi %s1639_s20, %s23_s20   ;;  %s1590_s19 = sphi %s1637_s19, %s2034_s19   ;;  %s1586_s18 = sphi %s1635_s18, %s2033_s18   ;;  %s1582_s17 = sphi %s1633_s17, %s2032_s17   ;;  %s1578_s16 = sphi %s1631_s16, %s2031_s16   ;;  %s1574_s15 = sphi %s1629_s15, %s2030_s15  }
   0xb   : > { %s1247_s22 = sadd.s32 4294967294, %s1594_s20   ;;  %p57_p0 = scmp.ne.s32.totalorder %s1578_s16, %s1574_s15 }
   0xc   : > { %p1663_p1 = scmp.eq.s32.totalorder %s1246_s21, 0  ;;  %p1667_p2 = scmp.eq.s32.totalorder %s1246_s21, 1 }
   0xd   : > { %p113_p3 = scmp.eq.s32.totalorder %s1247_s22, 1  ;;  %p1248_p5 = scmp.ge.s32.totalorder %s1594_s20, 1 }
   0xe   : > { %p1673_p4 = por %p1663_p1, %p57_p0  ;;  %p162_p7 = scmp.lt.s32.totalorder %s1594_s20, 3 }
   0xf   : > { %p1678_p6 = por %p113_p3, %p57_p0  ;;  %s2021_s1 = sld [smem:[#allocation17_spill]] }
  0x10   : > { %p1686_p8 = pnand %p1248_p5, %p162_p7  ;;  %s1596_s5 = smov [#allocation5]  }
  0x11   : > { %s178_s6 = sshll.u32 %s1596_s5, 4  ;;  %p1250_p11 = scmp.ge.s32.totalorder %s1594_s20, 2  ;;  %s179_s6 = int_to_ptr.vmem [resolvable:$true] %s178_s6 }
  0x12   : > { %p1311_p9 = pneg %p1686_p8  ;;  %s2010_s7 = smov 128  }
  0x13   : > { %s2011_s8 = smov 8   ;;  %s35_s9 = sadd.s32 1, %s1590_s19 }
  0x14   : > { %p1312_p10 = pnand %p1311_p9, %p1663_p1  ;;  %p37_p12 = scmp.ge.s32.totalorder %s35_s9, 2 }
  0x15   : > { %s176_s29 = sshll.u32 %s2021_s1, 4  ;;  %s44_s10 = sadd.s32 1, %s1582_s17  ;;  %s177_s29 = int_to_ptr.hbm [resolvable:$true] %s176_s29 }
  0x16   : > { %1314 = dma.hbm_to_vmem [thread:$0]  (!%p1312_p10), %s177_s29, 2048, %s179_s6, [#allocation6], %s2010_s7, %s2010_s7, %s2011_s8  }
  0x17   : > { %p51_p13 = scmp.ne.s32.totalorder %s1582_s17, %s1578_s16  ;;  %p52_p0 = scmp.eq.s32.totalorder %s1594_s20, 0 }
  0x18   : > { %s2036_s9 = smov (%p37_p12, %s35_s9), 0  ;;  %p1324_p7 = scmp.lt.s32.totalorder %s1594_s20, 2 }
  0x19   : > { %2023 = sst [smem:[#allocation16_spill]] %s2036_s9  ;;  %p1705_p3 = por %p52_p0, %p51_p13 }
  0x1a   : > { %p1711_p5 = por %p1667_p2, %p51_p13  ;;  %s39_s13 = ssub.s32 %s1590_s19, %s2036_s9 }
  0x1b   : > { %p42_p9 = scmp.eq.s32.totalorder %s39_s13, 0  ;;  %s192_s14 = sand.u32 1, %s1582_s17  }
  0x1c   : > { %s1251_s21 = sshll.u32 %s192_s14, 9  ;;  %s1268_s27 = sshll.u32 %s1590_s19, 9 }
  0x1d   : > { %s1720_s22 = scalar_select %p42_p9, %s1582_s17, %s44_s10  }
  0x1e   : > { %s202_s5 = scalar_lea.hbm %s2005_s0, %s1268_s27  ;;  %s196_s6 = scalar_lea.vmem [#allocation2], %s1251_s21 }
  0x1f   : > { %s205_s7 = sshll.u32 %s196_s6, 4  ;;  %s203_s8 = sshll.u32 %s202_s5, 4  ;;  %s206_s7 = int_to_ptr.vmem [resolvable:$true] %s205_s7  ;;  %s204_s8 = int_to_ptr.hbm [resolvable:$true] %s203_s8 }
  0x20   : > { %p1316_p10 = pnand %p1324_p7, %p1705_p3  ;;  %s193_s1 = scalar_lea.sflag [#allocation3], %s192_s14 }
  0x21   : > { %s2026_s9 = smov 8   ;;  %s2027_s20 = smov 128  }
  0x22   : > { %1318 = dma.hbm_to_vmem [thread:$0]  (!%p1316_p10), %s204_s8, 8192, %s206_s7, %s193_s1, %s2027_s20, %s2027_s20, %s2026_s9  }
  0x23   : > { %217 = sbr.rel (%p1686_p8) target bundleno = 479 (0x1df), region = 28  ;;  %s1734_s10 = sand.u32 (!%p1686_p8), 1, %s1578_s16  }
  0x24   : > { %s1255_s13 = sshll.u32 (!%p1686_p8), %s1734_s10, 9  ;;  %s220_s21 = scalar_lea.sflag (!%p1686_p8), [#allocation3], %s1734_s10 }
  0x25   : > { %s1740_s11 = scalar_lea.vmem (!%p1686_p8), [#allocation2], %s1255_s13 }
  0x28   : > { %1557 = dma.done.wait (%p1673_p4), %s220_s21, 8192  }
  0x29   : > { %1559 = vsyncadd (%p1673_p4), %s220_s21, 4294959104 }
  0x2a   : > { %1561 = dma.done.wait (%p1663_p1), [#allocation6], 2048  }
  0x2b   : > { %1563 = vsyncadd (%p1663_p1), [#allocation6], 4294965248  ;;  %v499_v0 = vld [vmem:[#allocation5 + $0x70] sm:$0xff]  ;;  %v500_v1 = vld [vmem:[#allocation5 + $0x78] sm:$0xff]  ;;  %s1816_s1 = scalar_lea.vmem [#allocation7], %s1255_s13  ;;  %p806_p1 = scmp.eq.s32.totalorder %s1586_s18, 0 }
  0x2c   : > { %v497_v2 = vld [vmem:[#allocation5 + $0x60] sm:$0xff]  ;;  %v508_v3 = vpack.c.bf16 %v500_v1, %v499_v0  ;;  %v498_v4 = vld [vmem:[#allocation5 + $0x68] sm:$0xff]  ;;  %v495_v6 = vld [vmem:[#allocation5 + $0x50] sm:$0xff] }
  0x2d   : > { %v507_v5 = vpack.c.bf16 %v498_v4, %v497_v2  ;;  %v496_v7 = vld [vmem:[#allocation5 + $0x58] sm:$0xff]  ;;  %v493_v9 = vld [vmem:[#allocation5 + $0x40] sm:$0xff]  ;;  %v494_v10 = vld [vmem:[#allocation5 + $0x48] sm:$0xff] }
  0x2e   : > { %509 = vmatpush.bf16.msra.mxu0 %v508_v3  ;;  %1271 = vmatpush.bf16.msra.mxu1 %v508_v3  ;;  %v506_v8 = vpack.c.bf16 %v496_v7, %v495_v6  ;;  %v505_v11 = vpack.c.bf16 %v494_v10, %v493_v9  ;;  %v491_v12 = vld [vmem:[#allocation5 + $0x30] sm:$0xff]  ;;  %v492_v13 = vld [vmem:[#allocation5 + $0x38] sm:$0xff]  ;;  %v489_v15 = vld [vmem:[#allocation5 + $0x20] sm:$0xff] }
  0x2f   : > { %1272 = vmatpush.bf16.msra.mxu2 %v508_v3  ;;  %1273 = vmatpush.bf16.msra.mxu3 %v508_v3  ;;  %v504_v14 = vpack.c.bf16 %v492_v13, %v491_v12  ;;  %v490_v16 = vld [vmem:[#allocation5 + $0x28] sm:$0xff]  ;;  %v487_v18 = vld [vmem:[#allocation5 + $0x10] sm:$0xff]  ;;  %v488_v19 = vld [vmem:[#allocation5 + $0x18] sm:$0xff] }
  0x30   : > { %v503_v17 = vpack.c.bf16 %v490_v16, %v489_v15  ;;  %v502_v20 = vpack.c.bf16 %v488_v19, %v487_v18  ;;  %v485_v21 = vld [vmem:[#allocation5] sm:$0xff]  ;;  %v486_v22 = vld [vmem:[#allocation5 + $0x8] sm:$0xff]  ;;  %v391_v36 = vld [vmem:[%s1740_s11 + $0x10] sm:$0xff] }
  0x31   : > { %v389_v23 = vld [vmem:[%s1740_s11] sm:$0xff]  ;;  %v390_v24 = vld [vmem:[%s1740_s11 + $0x8] sm:$0xff]  ;;  %v501_v25 = vpack.c.bf16 %v486_v22, %v485_v21  ;;  %v392_v37 = vld [vmem:[%s1740_s11 + $0x18] sm:$0xff] }
  0x32   : > { %510 = vmatpush.bf16.msra.mxu0 %v507_v5  ;;  %1274 = vmatpush.bf16.msra.mxu1 %v507_v5  ;;  %v405_v26 = vld [vmem:[%s1740_s11 + $0x80] sm:$0xff]  ;;  %v406_v27 = vld [vmem:[%s1740_s11 + $0x88] sm:$0xff]  ;;  %v453_v32 = vpack.c.bf16 %v390_v24, %v389_v23  ;;  %v407_v38 = vld [vmem:[%s1740_s11 + $0x90] sm:$0xff]  ;;  %v454_v44 = vpack.c.bf16 %v392_v37, %v391_v36 }
  0x33   : > { %1275 = vmatpush.bf16.msra.mxu2 %v507_v5  ;;  %1276 = vmatpush.bf16.msra.mxu3 %v507_v5  ;;  %v421_v28 = vld [vmem:[%s1740_s11 + $0x100] sm:$0xff]  ;;  %v422_v29 = vld [vmem:[%s1740_s11 + $0x108] sm:$0xff]  ;;  %v461_v33 = vpack.c.bf16 %v406_v27, %v405_v26  ;;  %v408_v39 = vld [vmem:[%s1740_s11 + $0x98] sm:$0xff] }
  0x34   : > { %v437_v30 = vld [vmem:[%s1740_s11 + $0x180] sm:$0xff]  ;;  %v438_v31 = vld [vmem:[%s1740_s11 + $0x188] sm:$0xff]  ;;  %v469_v34 = vpack.c.bf16 %v422_v29, %v421_v28  ;;  %v423_v40 = vld [vmem:[%s1740_s11 + $0x110] sm:$0xff]  ;;  %v462_v45 = vpack.c.bf16 %v408_v39, %v407_v38 }
  0x35   : > { %v477_v35 = vpack.c.bf16 %v438_v31, %v437_v30  ;;  %v424_v41 = vld [vmem:[%s1740_s11 + $0x118] sm:$0xff]  ;;  %v439_v42 = vld [vmem:[%s1740_s11 + $0x190] sm:$0xff]  ;;  %v393_v48 = vld [vmem:[%s1740_s11 + $0x20] sm:$0xff] }
  0x36   : > { %511 = vmatpush.bf16.msra.mxu0 %v506_v8  ;;  %1277 = vmatpush.bf16.msra.mxu1 %v506_v8  ;;  %v440_v43 = vld [vmem:[%s1740_s11 + $0x198] sm:$0xff]  ;;  %v470_v46 = vpack.c.bf16 %v424_v41, %v423_v40  ;;  %v394_v49 = vld [vmem:[%s1740_s11 + $0x28] sm:$0xff]  ;;  %v409_v50 = vld [vmem:[%s1740_s11 + $0xa0] sm:$0xff] }
  0x37   : > { %1278 = vmatpush.bf16.msra.mxu2 %v506_v8  ;;  %1279 = vmatpush.bf16.msra.mxu3 %v506_v8  ;;  %v478_v47 = vpack.c.bf16 %v440_v43, %v439_v42  ;;  %v410_v51 = vld [vmem:[%s1740_s11 + $0xa8] sm:$0xff]  ;;  %v425_v52 = vld [vmem:[%s1740_s11 + $0x120] sm:$0xff]  ;;  %v455_v56 = vpack.c.bf16 %v394_v49, %v393_v48  ;;  %v395_v60 = vld [vmem:[%s1740_s11 + $0x30] sm:$0xff] }
  0x38   : > { %v426_v53 = vld [vmem:[%s1740_s11 + $0x128] sm:$0xff]  ;;  %v441_v54 = vld [vmem:[%s1740_s11 + $0x1a0] sm:$0xff]  ;;  %v463_v57 = vpack.c.bf16 %v410_v51, %v409_v50  ;;  %v396_v61 = vld [vmem:[%s1740_s11 + $0x38] sm:$0xff] }
  0x39   : > { %v442_v55 = vld [vmem:[%s1740_s11 + $0x1a8] sm:$0xff]  ;;  %v471_v58 = vpack.c.bf16 %v426_v53, %v425_v52  ;;  %v411_v62 = vld [vmem:[%s1740_s11 + $0xb0] sm:$0xff]  ;;  %v412_v63 = vld [vmem:[%s1740_s11 + $0xb8] sm:$0xff]  ;;  %v456_v4 = vpack.c.bf16 %v396_v61, %v395_v60 }
  0x3a   : > { %512 = vmatpush.bf16.msra.mxu0 %v505_v11  ;;  %1280 = vmatpush.bf16.msra.mxu1 %v505_v11  ;;  %v479_v59 = vpack.c.bf16 %v442_v55, %v441_v54  ;;  %v427_v0 = vld [vmem:[%s1740_s11 + $0x130] sm:$0xff]  ;;  %v428_v1 = vld [vmem:[%s1740_s11 + $0x138] sm:$0xff]  ;;  %v464_v5 = vpack.c.bf16 %v412_v63, %v411_v62  ;;  %v397_v8 = vld [vmem:[%s1740_s11 + $0x40] sm:$0xff] }
  0x3b   : > { %1281 = vmatpush.bf16.msra.mxu2 %v505_v11  ;;  %1282 = vmatpush.bf16.msra.mxu3 %v505_v11  ;;  %v443_v2 = vld [vmem:[%s1740_s11 + $0x1b0] sm:$0xff]  ;;  %v444_v3 = vld [vmem:[%s1740_s11 + $0x1b8] sm:$0xff]  ;;  %v472_v6 = vpack.c.bf16 %v428_v1, %v427_v0  ;;  %v398_v9 = vld [vmem:[%s1740_s11 + $0x48] sm:$0xff] }
  0x3c   : > { %v480_v7 = vpack.c.bf16 %v444_v3, %v443_v2  ;;  %v413_v10 = vld [vmem:[%s1740_s11 + $0xc0] sm:$0xff]  ;;  %v414_v11 = vld [vmem:[%s1740_s11 + $0xc8] sm:$0xff]  ;;  %v457_v16 = vpack.c.bf16 %v398_v9, %v397_v8  ;;  %v400_v21 = vld [vmem:[%s1740_s11 + $0x58] sm:$0xff] }
  0x3d   : > { %v429_v12 = vld [vmem:[%s1740_s11 + $0x140] sm:$0xff]  ;;  %v430_v13 = vld [vmem:[%s1740_s11 + $0x148] sm:$0xff]  ;;  %v415_v22 = vld [vmem:[%s1740_s11 + $0xd0] sm:$0xff] }
  0x3e   : > { %513 = vmatpush.bf16.msra.mxu0 %v504_v14  ;;  %1283 = vmatpush.bf16.msra.mxu1 %v504_v14  ;;  %v446_v15 = vld [vmem:[%s1740_s11 + $0x1c8] sm:$0xff]  ;;  %v473_v18 = vpack.c.bf16 %v430_v13, %v429_v12  ;;  %v416_v23 = vld [vmem:[%s1740_s11 + $0xd8] sm:$0xff]  ;;  %v431_v24 = vld [vmem:[%s1740_s11 + $0x150] sm:$0xff] }
  0x3f   : > { %1284 = vmatpush.bf16.msra.mxu2 %v504_v14  ;;  %1285 = vmatpush.bf16.msra.mxu3 %v504_v14  ;;  %v445_v14 = vld [vmem:[%s1740_s11 + $0x1c0] sm:$0xff]  ;;  %v447_v26 = vld [vmem:[%s1740_s11 + $0x1d0] sm:$0xff]  ;;  %v448_v27 = vld [vmem:[%s1740_s11 + $0x1d8] sm:$0xff]  ;;  %v466_v29 = vpack.c.bf16 %v416_v23, %v415_v22 }
  0x40   : > { %v481_v19 = vpack.c.bf16 %v446_v15, %v445_v14  ;;  %v482_v31 = vpack.c.bf16 %v448_v27, %v447_v26  ;;  %v433_v36 = vld [vmem:[%s1740_s11 + $0x160] sm:$0xff]  ;;  %v434_v37 = vld [vmem:[%s1740_s11 + $0x168] sm:$0xff]  ;;  %v435_v48 = vld [vmem:[%s1740_s11 + $0x170] sm:$0xff] }
  0x41   : > { %v449_v38 = vld [vmem:[%s1740_s11 + $0x1e0] sm:$0xff]  ;;  %v450_v39 = vld [vmem:[%s1740_s11 + $0x1e8] sm:$0xff]  ;;  %v475_v42 = vpack.c.bf16 %v434_v37, %v433_v36  ;;  %v436_v49 = vld [vmem:[%s1740_s11 + $0x178] sm:$0xff] }
  0x42   : > { %514 = vmatpush.bf16.msra.mxu0 %v503_v17  ;;  %1286 = vmatpush.bf16.msra.mxu1 %v503_v17  ;;  %v483_v43 = vpack.c.bf16 %v450_v39, %v449_v38  ;;  %v451_v50 = vld [vmem:[%s1740_s11 + $0x1f0] sm:$0xff]  ;;  %v452_v51 = vld [vmem:[%s1740_s11 + $0x1f8] sm:$0xff]  ;;  %v476_v54 = vpack.c.bf16 %v436_v49, %v435_v48 }
  0x43   : > { %1287 = vmatpush.bf16.msra.mxu2 %v503_v17  ;;  %1288 = vmatpush.bf16.msra.mxu3 %v503_v17  ;;  %v465_v17 = vpack.c.bf16 %v414_v11, %v413_v10  ;;  %v484_v55 = vpack.c.bf16 %v452_v51, %v451_v50 }
  0x46   : > { %515 = vmatpush.bf16.msra.mxu0 %v502_v20  ;;  %1289 = vmatpush.bf16.msra.mxu1 %v502_v20 }
  0x47   : > { %1290 = vmatpush.bf16.msra.mxu2 %v502_v20  ;;  %1291 = vmatpush.bf16.msra.mxu3 %v502_v20  ;;  %v399_v20 = vld [vmem:[%s1740_s11 + $0x50] sm:$0xff] }
  0x48   : > { %v458_v28 = vpack.c.bf16 %v400_v21, %v399_v20 }
  0x4a   : > { %516 = vmatpush.bf16.msra.mxu0 %v501_v25  ;;  %1292 = vmatpush.bf16.msra.mxu1 %v501_v25 }
  0x4b   : > { %1293 = vmatpush.bf16.msra.mxu2 %v501_v25  ;;  %1294 = vmatpush.bf16.msra.mxu3 %v501_v25  ;;  %v432_v25 = vld [vmem:[%s1740_s11 + $0x158] sm:$0xff] }
  0x4c   : > { %v474_v30 = vpack.c.bf16 %v432_v25, %v431_v24 }
  0x4d   : > { %517 = vmatmul.bf16.vlgmr.msra.gmra.mxu0 %v453_v32  ;;  %557 = vmatmul.bf16.vlgmr.msra.gmra.mxu1 %v461_v33  ;;  %v401_v32 = vld [vmem:[%s1740_s11 + $0x60] sm:$0xff]  ;;  %v402_v33 = vld [vmem:[%s1740_s11 + $0x68] sm:$0xff] }
  0x4e   : > { %597 = vmatmul.bf16.vlgmr.msra.gmra.mxu2 %v469_v34  ;;  %637 = vmatmul.bf16.vlgmr.msra.gmra.mxu3 %v477_v35  ;;  %v417_v34 = vld [vmem:[%s1740_s11 + $0xe0] sm:$0xff]  ;;  %v418_v35 = vld [vmem:[%s1740_s11 + $0xe8] sm:$0xff]  ;;  %v459_v40 = vpack.c.bf16 %v402_v33, %v401_v32 }
  0x4f   : > { %v467_v41 = vpack.c.bf16 %v418_v35, %v417_v34 }
  0x5d   : > { %522 = vmatmul.bf16.gmra.mxu0 %v454_v44  ;;  %562 = vmatmul.bf16.gmra.mxu1 %v462_v45  ;;  %v403_v44 = vld [vmem:[%s1740_s11 + $0x70] sm:$0xff]  ;;  %v404_v45 = vld [vmem:[%s1740_s11 + $0x78] sm:$0xff] }
  0x5e   : > { %602 = vmatmul.bf16.gmra.mxu2 %v470_v46  ;;  %642 = vmatmul.bf16.gmra.mxu3 %v478_v47  ;;  %v419_v46 = vld [vmem:[%s1740_s11 + $0xf0] sm:$0xff]  ;;  %v420_v47 = vld [vmem:[%s1740_s11 + $0xf8] sm:$0xff]  ;;  %v460_v52 = vpack.c.bf16 %v404_v45, %v403_v44 }
  0x5f   : > { %v468_v53 = vpack.c.bf16 %v420_v47, %v419_v46 }
  0x6d   : > { %527 = vmatmul.bf16.gmra.mxu0 %v455_v56  ;;  %567 = vmatmul.bf16.gmra.mxu1 %v463_v57 }
  0x6e   : > { %607 = vmatmul.bf16.gmra.mxu2 %v471_v58  ;;  %647 = vmatmul.bf16.gmra.mxu3 %v479_v59 }
  0x7d   : > { %532 = vmatmul.bf16.gmra.mxu0 %v456_v4  ;;  %572 = vmatmul.bf16.gmra.mxu1 %v464_v5 }
  0x7e   : > { %612 = vmatmul.bf16.gmra.mxu2 %v472_v6  ;;  %652 = vmatmul.bf16.gmra.mxu3 %v480_v7 }
  0x8d   : > { %537 = vmatmul.bf16.gmra.mxu0 %v457_v16  ;;  %577 = vmatmul.bf16.gmra.mxu1 %v465_v17 }
  0x8e   : > { %617 = vmatmul.bf16.gmra.mxu2 %v473_v18  ;;  %657 = vmatmul.bf16.gmra.mxu3 %v481_v19 }
  0x9d   : > { %542 = vmatmul.bf16.gmra.mxu0 %v458_v28  ;;  %582 = vmatmul.bf16.gmra.mxu1 %v466_v29 }
  0x9e   : > { %622 = vmatmul.bf16.gmra.mxu2 %v474_v30  ;;  %662 = vmatmul.bf16.gmra.mxu3 %v482_v31 }
  0xad   : > { %547 = vmatmul.bf16.gmra.mxu0 %v459_v40  ;;  %587 = vmatmul.bf16.gmra.mxu1 %v467_v41 }
  0xae   : > { %627 = vmatmul.bf16.gmra.mxu2 %v475_v42  ;;  %667 = vmatmul.bf16.gmra.mxu3 %v483_v43 }
  0xbd   : > { %552 = vmatmul.bf16.gmra.mxu0 %v460_v52  ;;  %592 = vmatmul.bf16.gmra.mxu1 %v468_v53 }
  0xbe   : > { %632 = vmatmul.bf16.gmra.mxu2 %v476_v54  ;;  %672 = vmatmul.bf16.gmra.mxu3 %v484_v55 }
  0xca   : > { %v518_v56 = vpop.f32.mrf.mxu0  ;;  %v558_v57 = vpop.f32.mrf.mxu1 }
  0xcb   : > { %742 = vst [vmem:[%s1816_s1] sm:$0xff] %v518_v56  ;;  %v1599_v56 = vmov (%p806_p1), 0.0  }
  0xcc   : > { %758 = vst [vmem:[%s1816_s1 + $0x80] sm:$0xff] %v558_v57 }
  0xcd   : > { %811 = vst [vmem:[#allocation8] sm:$0x1] (%p806_p1), %v1599_v56 }
  0xce   : > { %812 = vst [vmem:[#allocation10] sm:$0x1] (%p806_p1), %v1599_v56 }
  0xd1   : > { %v598_v58 = vpop.f32.mrf.mxu2  ;;  %v638_v59 = vpop.f32.mrf.mxu3 }
  0xd2   : > { %v520_v60 = vpop.f32.mrf.mxu0  ;;  %v560_v61 = vpop.f32.mrf.mxu1  ;;  %774 = vst [vmem:[%s1816_s1 + $0x100] sm:$0xff] %v598_v58 }
  0xd3   : > { %790 = vst [vmem:[%s1816_s1 + $0x180] sm:$0xff] %v638_v59 }
  0xd4   : > { %743 = vst [vmem:[%s1816_s1 + $0x8] sm:$0xff] %v520_v60 }
  0xd5   : > { %759 = vst [vmem:[%s1816_s1 + $0x88] sm:$0xff] %v560_v61 }
  0xd9   : > { %v600_v62 = vpop.f32.mrf.mxu2  ;;  %v640_v63 = vpop.f32.mrf.mxu3 }
  0xda   : > { %v523_v0 = vpop.f32.mrf.mxu0  ;;  %v563_v1 = vpop.f32.mrf.mxu1  ;;  %775 = vst [vmem:[%s1816_s1 + $0x108] sm:$0xff] %v600_v62 }
  0xdb   : > { %791 = vst [vmem:[%s1816_s1 + $0x188] sm:$0xff] %v640_v63 }
  0xdc   : > { %744 = vst [vmem:[%s1816_s1 + $0x10] sm:$0xff] %v523_v0 }
  0xdd   : > { %760 = vst [vmem:[%s1816_s1 + $0x90] sm:$0xff] %v563_v1 }
  0xe1   : > { %v603_v2 = vpop.f32.mrf.mxu2  ;;  %v643_v3 = vpop.f32.mrf.mxu3 }
  0xe2   : > { %v525_v4 = vpop.f32.mrf.mxu0  ;;  %v565_v5 = vpop.f32.mrf.mxu1  ;;  %776 = vst [vmem:[%s1816_s1 + $0x110] sm:$0xff] %v603_v2 }
  0xe3   : > { %792 = vst [vmem:[%s1816_s1 + $0x190] sm:$0xff] %v643_v3 }
  0xe4   : > { %745 = vst [vmem:[%s1816_s1 + $0x18] sm:$0xff] %v525_v4 }
  0xe5   : > { %761 = vst [vmem:[%s1816_s1 + $0x98] sm:$0xff] %v565_v5 }
  0xe9   : > { %v605_v6 = vpop.f32.mrf.mxu2  ;;  %v645_v7 = vpop.f32.mrf.mxu3 }
  0xea   : > { %v528_v8 = vpop.f32.mrf.mxu0  ;;  %v568_v9 = vpop.f32.mrf.mxu1  ;;  %777 = vst [vmem:[%s1816_s1 + $0x118] sm:$0xff] %v605_v6 }
  0xeb   : > { %793 = vst [vmem:[%s1816_s1 + $0x198] sm:$0xff] %v645_v7 }
  0xec   : > { %746 = vst [vmem:[%s1816_s1 + $0x20] sm:$0xff] %v528_v8 }
  0xed   : > { %762 = vst [vmem:[%s1816_s1 + $0xa0] sm:$0xff] %v568_v9 }
  0xf1   : > { %v608_v10 = vpop.f32.mrf.mxu2  ;;  %v648_v11 = vpop.f32.mrf.mxu3 }
  0xf2   : > { %v530_v12 = vpop.f32.mrf.mxu0  ;;  %v570_v13 = vpop.f32.mrf.mxu1  ;;  %778 = vst [vmem:[%s1816_s1 + $0x120] sm:$0xff] %v608_v10 }
  0xf3   : > { %794 = vst [vmem:[%s1816_s1 + $0x1a0] sm:$0xff] %v648_v11 }
  0xf4   : > { %747 = vst [vmem:[%s1816_s1 + $0x28] sm:$0xff] %v530_v12 }
  0xf5   : > { %763 = vst [vmem:[%s1816_s1 + $0xa8] sm:$0xff] %v570_v13 }
  0xf9   : > { %v610_v14 = vpop.f32.mrf.mxu2  ;;  %v650_v15 = vpop.f32.mrf.mxu3 }
  0xfa   : > { %v533_v16 = vpop.f32.mrf.mxu0  ;;  %v573_v17 = vpop.f32.mrf.mxu1  ;;  %779 = vst [vmem:[%s1816_s1 + $0x128] sm:$0xff] %v610_v14 }
  0xfb   : > { %795 = vst [vmem:[%s1816_s1 + $0x1a8] sm:$0xff] %v650_v15 }
  0xfc   : > { %748 = vst [vmem:[%s1816_s1 + $0x30] sm:$0xff] %v533_v16 }
  0xfd   : > { %764 = vst [vmem:[%s1816_s1 + $0xb0] sm:$0xff] %v573_v17 }
 0x101   : > { %v613_v18 = vpop.f32.mrf.mxu2  ;;  %v653_v19 = vpop.f32.mrf.mxu3 }
 0x102   : > { %v535_v20 = vpop.f32.mrf.mxu0  ;;  %v575_v21 = vpop.f32.mrf.mxu1  ;;  %780 = vst [vmem:[%s1816_s1 + $0x130] sm:$0xff] %v613_v18 }
 0x103   : > { %796 = vst [vmem:[%s1816_s1 + $0x1b0] sm:$0xff] %v653_v19 }
 0x104   : > { %749 = vst [vmem:[%s1816_s1 + $0x38] sm:$0xff] %v535_v20 }
 0x105   : > { %765 = vst [vmem:[%s1816_s1 + $0xb8] sm:$0xff] %v575_v21 }
 0x109   : > { %v615_v22 = vpop.f32.mrf.mxu2  ;;  %v655_v23 = vpop.f32.mrf.mxu3 }
 0x10a   : > { %v538_v24 = vpop.f32.mrf.mxu0  ;;  %v578_v25 = vpop.f32.mrf.mxu1  ;;  %781 = vst [vmem:[%s1816_s1 + $0x138] sm:$0xff] %v615_v22 }
 0x10b   : > { %797 = vst [vmem:[%s1816_s1 + $0x1b8] sm:$0xff] %v655_v23 }
 0x10c   : > { %750 = vst [vmem:[%s1816_s1 + $0x40] sm:$0xff] %v538_v24 }
 0x10d   : > { %766 = vst [vmem:[%s1816_s1 + $0xc0] sm:$0xff] %v578_v25 }
 0x111   : > { %v618_v26 = vpop.f32.mrf.mxu2  ;;  %v658_v27 = vpop.f32.mrf.mxu3 }
 0x112   : > { %v540_v28 = vpop.f32.mrf.mxu0  ;;  %v580_v29 = vpop.f32.mrf.mxu1  ;;  %782 = vst [vmem:[%s1816_s1 + $0x140] sm:$0xff] %v618_v26 }
 0x113   : > { %798 = vst [vmem:[%s1816_s1 + $0x1c0] sm:$0xff] %v658_v27 }
 0x114   : > { %751 = vst [vmem:[%s1816_s1 + $0x48] sm:$0xff] %v540_v28 }
 0x115   : > { %767 = vst [vmem:[%s1816_s1 + $0xc8] sm:$0xff] %v580_v29 }
 0x119   : > { %v620_v30 = vpop.f32.mrf.mxu2  ;;  %v660_v31 = vpop.f32.mrf.mxu3 }
 0x11a   : > { %v543_v32 = vpop.f32.mrf.mxu0  ;;  %v583_v33 = vpop.f32.mrf.mxu1  ;;  %783 = vst [vmem:[%s1816_s1 + $0x148] sm:$0xff] %v620_v30 }
 0x11b   : > { %799 = vst [vmem:[%s1816_s1 + $0x1c8] sm:$0xff] %v660_v31 }
 0x11c   : > { %752 = vst [vmem:[%s1816_s1 + $0x50] sm:$0xff] %v543_v32 }
 0x11d   : > { %768 = vst [vmem:[%s1816_s1 + $0xd0] sm:$0xff] %v583_v33 }
 0x121   : > { %v623_v34 = vpop.f32.mrf.mxu2  ;;  %v663_v35 = vpop.f32.mrf.mxu3 }
 0x122   : > { %v545_v36 = vpop.f32.mrf.mxu0  ;;  %v585_v37 = vpop.f32.mrf.mxu1  ;;  %784 = vst [vmem:[%s1816_s1 + $0x150] sm:$0xff] %v623_v34 }
 0x123   : > { %800 = vst [vmem:[%s1816_s1 + $0x1d0] sm:$0xff] %v663_v35 }
 0x124   : > { %753 = vst [vmem:[%s1816_s1 + $0x58] sm:$0xff] %v545_v36 }
 0x125   : > { %769 = vst [vmem:[%s1816_s1 + $0xd8] sm:$0xff] %v585_v37 }
 0x129   : > { %v625_v38 = vpop.f32.mrf.mxu2  ;;  %v665_v39 = vpop.f32.mrf.mxu3 }
 0x12a   : > { %v548_v40 = vpop.f32.mrf.mxu0  ;;  %v588_v41 = vpop.f32.mrf.mxu1  ;;  %785 = vst [vmem:[%s1816_s1 + $0x158] sm:$0xff] %v625_v38 }
 0x12b   : > { %801 = vst [vmem:[%s1816_s1 + $0x1d8] sm:$0xff] %v665_v39 }
 0x12c   : > { %754 = vst [vmem:[%s1816_s1 + $0x60] sm:$0xff] %v548_v40 }
 0x12d   : > { %770 = vst [vmem:[%s1816_s1 + $0xe0] sm:$0xff] %v588_v41 }
 0x131   : > { %v628_v42 = vpop.f32.mrf.mxu2  ;;  %v668_v43 = vpop.f32.mrf.mxu3 }
 0x132   : > { %v550_v44 = vpop.f32.mrf.mxu0  ;;  %v590_v45 = vpop.f32.mrf.mxu1  ;;  %786 = vst [vmem:[%s1816_s1 + $0x160] sm:$0xff] %v628_v42 }
 0x133   : > { %802 = vst [vmem:[%s1816_s1 + $0x1e0] sm:$0xff] %v668_v43 }
 0x134   : > { %755 = vst [vmem:[%s1816_s1 + $0x68] sm:$0xff] %v550_v44 }
 0x135   : > { %771 = vst [vmem:[%s1816_s1 + $0xe8] sm:$0xff] %v590_v45 }
 0x139   : > { %v630_v46 = vpop.f32.mrf.mxu2  ;;  %v670_v47 = vpop.f32.mrf.mxu3 }
 0x13a   : > { %v553_v48 = vpop.f32.mrf.mxu0  ;;  %v593_v49 = vpop.f32.mrf.mxu1  ;;  %787 = vst [vmem:[%s1816_s1 + $0x168] sm:$0xff] %v630_v46 }
 0x13b   : > { %803 = vst [vmem:[%s1816_s1 + $0x1e8] sm:$0xff] %v670_v47 }
 0x13c   : > { %756 = vst [vmem:[%s1816_s1 + $0x70] sm:$0xff] %v553_v48 }
 0x13d   : > { %772 = vst [vmem:[%s1816_s1 + $0xf0] sm:$0xff] %v593_v49 }
 0x141   : > { %v633_v50 = vpop.f32.mrf.mxu2  ;;  %v673_v51 = vpop.f32.mrf.mxu3 }
 0x142   : > { %v555_v52 = vpop.f32.mrf.mxu0  ;;  %v595_v53 = vpop.f32.mrf.mxu1  ;;  %788 = vst [vmem:[%s1816_s1 + $0x170] sm:$0xff] %v633_v50 }
 0x143   : > { %804 = vst [vmem:[%s1816_s1 + $0x1f0] sm:$0xff] %v673_v51 }
 0x144   : > { %757 = vst [vmem:[%s1816_s1 + $0x78] sm:$0xff] %v555_v52 }
 0x145   : > { %773 = vst [vmem:[%s1816_s1 + $0xf8] sm:$0xff] %v595_v53 }
 0x147   : > { %810 = sbr.rel (!%p806_p1) target bundleno = 332 (0x14c), region = 44 }
 0x149   : > { %v635_v54 = vpop.f32.mrf.mxu2  ;;  %v675_v55 = vpop.f32.mrf.mxu3 }
 0x14a   : > { %789 = vst [vmem:[%s1816_s1 + $0x178] sm:$0xff] %v635_v54 }
 0x14b   : > { %805 = vst [vmem:[%s1816_s1 + $0x1f8] sm:$0xff] %v675_v55 }
 0x14c PF: > { %v816_v57 = vld [vmem:[%s1816_s1] sm:$0xff]  ;;  %v817_v58 = vld [vmem:[%s1816_s1 + $0x8] sm:$0xff]  ;;  %v818_v59 = vld [vmem:[%s1816_s1 + $0x10] sm:$0xff]  ;;  %s1270_s20 = sshll.u32 %s1586_s18, 9  ;;  %s1101_s7 = sshll.u32 %s1816_s1, 4  ;;  %s1902_s7 = int_to_ptr.vmem [resolvable:$true] %s1101_s7 }
 0x14d   : > { %v819_v60 = vld [vmem:[%s1816_s1 + $0x18] sm:$0xff]  ;;  %v881_v61 = vadd.f32 %v817_v58, %v816_v57  ;;  %v953_v62 = vmul.f32 %v816_v57, %v816_v57  ;;  %v954_v63 = vmul.f32 %v817_v58, %v817_v58  ;;  %v955_v0 = vmul.f32 %v818_v59, %v818_v59  ;;  %v820_v1 = vld [vmem:[%s1816_s1 + $0x20] sm:$0xff]  ;;  %v821_v5 = vld [vmem:[%s1816_s1 + $0x28] sm:$0xff]  ;;  %s1100_s30 = scalar_lea.hbm %s2007_s2, %s1270_s20  ;;  %s1089_s18 = scalar_lea.sflag [#allocation4], %s1734_s10 }
 0x14e   : > { %v956_v3 = vmul.f32 %v819_v60, %v819_v60  ;;  %v957_v7 = vmul.f32 %v820_v1, %v820_v1  ;;  %v822_v9 = vld [vmem:[%s1816_s1 + $0x30] sm:$0xff]  ;;  %v958_v11 = vmul.f32 %v821_v5, %v821_v5  ;;  %v823_v13 = vld [vmem:[%s1816_s1 + $0x38] sm:$0xff]  ;;  %v824_v17 = vld [vmem:[%s1816_s1 + $0x40] sm:$0xff]  ;;  %s1103_s8 = sshll.u32 %s1100_s30, 4  ;;  %s1468_s29 = scalar_lea.hbm %s2007_s2, 1024  ;;  %s1104_s8 = int_to_ptr.hbm [resolvable:$true] %s1103_s8 }
 0x14f   : > { %v882_v2 = vadd.f32 %v881_v61, %v818_v59  ;;  %v1017_v4 = vadd.f32 %v954_v63, %v953_v62  ;;  %v959_v15 = vmul.f32 %v822_v9, %v822_v9  ;;  %v960_v19 = vmul.f32 %v823_v13, %v823_v13  ;;  %v825_v21 = vld [vmem:[%s1816_s1 + $0x48] sm:$0xff]  ;;  %v826_v25 = vld [vmem:[%s1816_s1 + $0x50] sm:$0xff]  ;;  %v827_v29 = vld [vmem:[%s1816_s1 + $0x58] sm:$0xff]  ;;  %s1462_s9 = sshra.s32 %s1104_s8, 4  ;;  %s1463_s9 = int_to_ptr.hbm [resolvable:$true] %s1462_s9 }
 0x150   : > { %v961_v23 = vmul.f32 %v824_v17, %v824_v17  ;;  %v962_v27 = vmul.f32 %v825_v21, %v825_v21  ;;  %v963_v31 = vmul.f32 %v826_v25, %v826_v25  ;;  %v828_v33 = vld [vmem:[%s1816_s1 + $0x60] sm:$0xff]  ;;  %v964_v35 = vmul.f32 %v827_v29, %v827_v29  ;;  %v829_v37 = vld [vmem:[%s1816_s1 + $0x68] sm:$0xff]  ;;  %s1464_s14 = scalar_lea.hbm %s1463_s9, 512  ;;  %p1469_p13 = scmp.lt.s32.totalorder %s1463_s9, %s2007_s2 }
 0x151   : > { %v883_v6 = vadd.f32 %v882_v2, %v819_v60  ;;  %v1018_v8 = vadd.f32 %v1017_v4, %v955_v0  ;;  %v965_v39 = vmul.f32 %v828_v33, %v828_v33  ;;  %p1465_p4 = scmp.ne.s32.totalorder %s1463_s9, %s1464_s14  ;;  %p1470_p0 = scmp.lt.s32.totalorder %s1468_s29, %s1464_s14 }
 0x153   : > { %v884_v10 = vadd.f32 %v883_v6, %v820_v1  ;;  %v1019_v12 = vadd.f32 %v1018_v8, %v956_v3  ;;  %p1466_p8 = pnand %p1465_p4, %p1711_p5  ;;  %p1471_p3 = por %p1470_p0, %p1469_p13 }
 0x155   : > { %v885_v14 = vadd.f32 %v884_v10, %v821_v5  ;;  %v1020_v16 = vadd.f32 %v1019_v12, %v957_v7  ;;  %p1467_p12 = pneg %p1466_p8 }
 0x157   : > { %v886_v18 = vadd.f32 %v885_v14, %v822_v9  ;;  %v1021_v20 = vadd.f32 %v1020_v16, %v958_v11  ;;  %p1472_p7 = pnand %p1471_p3, %p1467_p12 }
 0x159   : > { %v887_v22 = vadd.f32 %v886_v18, %v823_v13  ;;  %v1022_v24 = vadd.f32 %v1021_v20, %v959_v15 }
 0x15b   : > { %v888_v26 = vadd.f32 %v887_v22, %v824_v17  ;;  %v1023_v28 = vadd.f32 %v1022_v24, %v960_v19 }
 0x15d   : > { %v889_v30 = vadd.f32 %v888_v26, %v825_v21  ;;  %v1024_v32 = vadd.f32 %v1023_v28, %v961_v23 }
 0x15f   : > { %v890_v34 = vadd.f32 %v889_v30, %v826_v25  ;;  %v1025_v36 = vadd.f32 %v1024_v32, %v962_v27 }
 0x161   : > { %v891_v38 = vadd.f32 %v890_v34, %v827_v29  ;;  %v1026_v40 = vadd.f32 %v1025_v36, %v963_v31 }
 0x162   : > { %1475 = shalt.err (!%p1472_p7)
}
 0x163   : > { %s1600_s10 = smov 128   ;;  %s1601_s13 = smov 8   ;;  %v830_v41 = vld [vmem:[%s1816_s1 + $0x70] sm:$0xff]  ;;  %v892_v42 = vadd.f32 %v891_v38, %v828_v33  ;;  %v966_v43 = vmul.f32 %v829_v37, %v829_v37  ;;  %v1027_v44 = vadd.f32 %v1026_v40, %v964_v35  ;;  %v831_v45 = vld [vmem:[%s1816_s1 + $0x78] sm:$0xff]  ;;  %v832_v49 = vld [vmem:[%s1816_s1 + $0x80] sm:$0xff] }
 0x164   : > { %1301 = dma.vmem_to_hbm [thread:$0]  (%p1711_p5), %s1902_s7, 8192, %s1104_s8, %s1089_s18, %s1600_s10, %s1600_s10, %s1601_s13   ;;  %v967_v47 = vmul.f32 %v830_v41, %v830_v41  ;;  %v968_v51 = vmul.f32 %v831_v45, %v831_v45  ;;  %v969_v55 = vmul.f32 %v832_v49, %v832_v49 }
 0x165   : > { %v893_v46 = vadd.f32 %v892_v42, %v829_v37  ;;  %v1028_v48 = vadd.f32 %v1027_v44, %v965_v39  ;;  %v833_v53 = vld [vmem:[%s1816_s1 + $0x88] sm:$0xff]  ;;  %v834_v57 = vld [vmem:[%s1816_s1 + $0x90] sm:$0xff]  ;;  %v835_v61 = vld [vmem:[%s1816_s1 + $0x98] sm:$0xff]  ;;  %s1602_s12 = smov [#allocation8]   ;;  %s1118_s20 = sshll.u32 %s2008_s3, 4  ;;  %s1119_s20 = int_to_ptr.hbm [resolvable:$true] %s1118_s20 }
 0x166   : > { %v970_v59 = vmul.f32 %v833_v53, %v833_v53  ;;  %v971_v63 = vmul.f32 %v834_v57, %v834_v57  ;;  %v836_v1 = vld [vmem:[%s1816_s1 + $0xa0] sm:$0xff]  ;;  %v972_v3 = vmul.f32 %v835_v61, %v835_v61  ;;  %v837_v5 = vld [vmem:[%s1816_s1 + $0xa8] sm:$0xff]  ;;  %v838_v9 = vld [vmem:[%s1816_s1 + $0xb0] sm:$0xff]  ;;  %s1116_s21 = sshll.u32 %s1602_s12, 4  ;;  %s1603_s23 = smov [#allocation10]   ;;  %s1117_s21 = int_to_ptr.vmem [resolvable:$true] %s1116_s21 }
 0x167   : > { %v894_v50 = vadd.f32 %v893_v46, %v830_v41  ;;  %v1029_v52 = vadd.f32 %v1028_v48, %v966_v43  ;;  %v973_v7 = vmul.f32 %v836_v1, %v836_v1  ;;  %v974_v11 = vmul.f32 %v837_v5, %v837_v5  ;;  %v839_v13 = vld [vmem:[%s1816_s1 + $0xb8] sm:$0xff]  ;;  %v840_v17 = vld [vmem:[%s1816_s1 + $0xc0] sm:$0xff]  ;;  %v841_v21 = vld [vmem:[%s1816_s1 + $0xc8] sm:$0xff]  ;;  %s1128_s25 = sshll.u32 %s1603_s23, 4  ;;  %s1130_s8 = sshll.u32 %s2009_s4, 4  ;;  %s1129_s25 = int_to_ptr.vmem [resolvable:$true] %s1128_s25  ;;  %s1131_s8 = int_to_ptr.hbm [resolvable:$true] %s1130_s8 }
 0x168   : > { %v975_v15 = vmul.f32 %v838_v9, %v838_v9  ;;  %v976_v19 = vmul.f32 %v839_v13, %v839_v13  ;;  %v977_v23 = vmul.f32 %v840_v17, %v840_v17  ;;  %v842_v25 = vld [vmem:[%s1816_s1 + $0xd0] sm:$0xff]  ;;  %v978_v27 = vmul.f32 %v841_v21, %v841_v21  ;;  %v843_v29 = vld [vmem:[%s1816_s1 + $0xd8] sm:$0xff]  ;;  %v844_v33 = vld [vmem:[%s1816_s1 + $0xe0] sm:$0xff] }
 0x169   : > { %v895_v54 = vadd.f32 %v894_v50, %v831_v45  ;;  %v1030_v56 = vadd.f32 %v1029_v52, %v967_v47  ;;  %v979_v31 = vmul.f32 %v842_v25, %v842_v25  ;;  %v980_v35 = vmul.f32 %v843_v29, %v843_v29  ;;  %v845_v37 = vld [vmem:[%s1816_s1 + $0xe8] sm:$0xff]  ;;  %v846_v41 = vld [vmem:[%s1816_s1 + $0xf0] sm:$0xff]  ;;  %v847_v45 = vld [vmem:[%s1816_s1 + $0xf8] sm:$0xff] }
 0x16a   : > { %v981_v39 = vmul.f32 %v844_v33, %v844_v33  ;;  %v982_v43 = vmul.f32 %v845_v37, %v845_v37  ;;  %v983_v47 = vmul.f32 %v846_v41, %v846_v41 }
 0x16b   : > { %v896_v58 = vadd.f32 %v895_v54, %v832_v49  ;;  %v1031_v60 = vadd.f32 %v1030_v56, %v968_v51  ;;  %v848_v49 = vld [vmem:[%s1816_s1 + $0x100] sm:$0xff]  ;;  %v984_v51 = vmul.f32 %v847_v45, %v847_v45 }
 0x16d   : > { %v897_v62 = vadd.f32 %v896_v58, %v833_v53  ;;  %v1032_v0 = vadd.f32 %v1031_v60, %v969_v55  ;;  %v849_v53 = vld [vmem:[%s1816_s1 + $0x108] sm:$0xff]  ;;  %v985_v55 = vmul.f32 %v848_v49, %v848_v49 }
 0x16f   : > { %v898_v2 = vadd.f32 %v897_v62, %v834_v57  ;;  %v1033_v4 = vadd.f32 %v1032_v0, %v970_v59  ;;  %v850_v57 = vld [vmem:[%s1816_s1 + $0x110] sm:$0xff]  ;;  %v986_v59 = vmul.f32 %v849_v53, %v849_v53 }
 0x171   : > { %v899_v6 = vadd.f32 %v898_v2, %v835_v61  ;;  %v1034_v8 = vadd.f32 %v1033_v4, %v971_v63  ;;  %v851_v61 = vld [vmem:[%s1816_s1 + $0x118] sm:$0xff]  ;;  %v987_v63 = vmul.f32 %v850_v57, %v850_v57 }
 0x173   : > { %v900_v10 = vadd.f32 %v899_v6, %v836_v1  ;;  %v1035_v12 = vadd.f32 %v1034_v8, %v972_v3  ;;  %v852_v1 = vld [vmem:[%s1816_s1 + $0x120] sm:$0xff]  ;;  %v988_v3 = vmul.f32 %v851_v61, %v851_v61 }
 0x175   : > { %v901_v14 = vadd.f32 %v900_v10, %v837_v5  ;;  %v1036_v16 = vadd.f32 %v1035_v12, %v973_v7  ;;  %v853_v5 = vld [vmem:[%s1816_s1 + $0x128] sm:$0xff]  ;;  %v989_v7 = vmul.f32 %v852_v1, %v852_v1 }
 0x177   : > { %v902_v18 = vadd.f32 %v901_v14, %v838_v9  ;;  %v1037_v20 = vadd.f32 %v1036_v16, %v974_v11  ;;  %v854_v9 = vld [vmem:[%s1816_s1 + $0x130] sm:$0xff]  ;;  %v990_v11 = vmul.f32 %v853_v5, %v853_v5 }
 0x179   : > { %v903_v22 = vadd.f32 %v902_v18, %v839_v13  ;;  %v1038_v24 = vadd.f32 %v1037_v20, %v975_v15  ;;  %v855_v13 = vld [vmem:[%s1816_s1 + $0x138] sm:$0xff]  ;;  %v991_v15 = vmul.f32 %v854_v9, %v854_v9 }
 0x17b   : > { %v904_v26 = vadd.f32 %v903_v22, %v840_v17  ;;  %v1039_v28 = vadd.f32 %v1038_v24, %v976_v19  ;;  %v856_v17 = vld [vmem:[%s1816_s1 + $0x140] sm:$0xff]  ;;  %v992_v19 = vmul.f32 %v855_v13, %v855_v13 }
 0x17d   : > { %v905_v30 = vadd.f32 %v904_v26, %v841_v21  ;;  %v1040_v32 = vadd.f32 %v1039_v28, %v977_v23  ;;  %v857_v21 = vld [vmem:[%s1816_s1 + $0x148] sm:$0xff]  ;;  %v993_v23 = vmul.f32 %v856_v17, %v856_v17 }
 0x17f   : > { %v906_v34 = vadd.f32 %v905_v30, %v842_v25  ;;  %v1041_v36 = vadd.f32 %v1040_v32, %v978_v27  ;;  %v858_v25 = vld [vmem:[%s1816_s1 + $0x150] sm:$0xff]  ;;  %v994_v27 = vmul.f32 %v857_v21, %v857_v21 }
 0x181   : > { %v907_v38 = vadd.f32 %v906_v34, %v843_v29  ;;  %v1042_v40 = vadd.f32 %v1041_v36, %v979_v31  ;;  %v859_v29 = vld [vmem:[%s1816_s1 + $0x158] sm:$0xff]  ;;  %v995_v31 = vmul.f32 %v858_v25, %v858_v25 }
 0x183   : > { %v908_v42 = vadd.f32 %v907_v38, %v844_v33  ;;  %v1043_v44 = vadd.f32 %v1042_v40, %v980_v35  ;;  %v860_v33 = vld [vmem:[%s1816_s1 + $0x160] sm:$0xff]  ;;  %v996_v35 = vmul.f32 %v859_v29, %v859_v29 }
 0x185   : > { %v909_v46 = vadd.f32 %v908_v42, %v845_v37  ;;  %v1044_v48 = vadd.f32 %v1043_v44, %v981_v39  ;;  %v861_v37 = vld [vmem:[%s1816_s1 + $0x168] sm:$0xff]  ;;  %v997_v39 = vmul.f32 %v860_v33, %v860_v33 }
 0x187   : > { %v910_v50 = vadd.f32 %v909_v46, %v846_v41  ;;  %v1045_v52 = vadd.f32 %v1044_v48, %v982_v43  ;;  %v862_v41 = vld [vmem:[%s1816_s1 + $0x170] sm:$0xff]  ;;  %v998_v43 = vmul.f32 %v861_v37, %v861_v37 }
 0x189   : > { %v911_v54 = vadd.f32 %v910_v50, %v847_v45  ;;  %v1046_v56 = vadd.f32 %v1045_v52, %v983_v47  ;;  %v863_v45 = vld [vmem:[%s1816_s1 + $0x178] sm:$0xff]  ;;  %v999_v47 = vmul.f32 %v862_v41, %v862_v41 }
 0x18b   : > { %v912_v58 = vadd.f32 %v911_v54, %v848_v49  ;;  %v1047_v60 = vadd.f32 %v1046_v56, %v984_v51  ;;  %v864_v49 = vld [vmem:[%s1816_s1 + $0x180] sm:$0xff]  ;;  %v1000_v51 = vmul.f32 %v863_v45, %v863_v45 }
 0x18d   : > { %v913_v62 = vadd.f32 %v912_v58, %v849_v53  ;;  %v1048_v0 = vadd.f32 %v1047_v60, %v985_v55  ;;  %v865_v53 = vld [vmem:[%s1816_s1 + $0x188] sm:$0xff]  ;;  %v1001_v55 = vmul.f32 %v864_v49, %v864_v49 }
 0x18f   : > { %v914_v2 = vadd.f32 %v913_v62, %v850_v57  ;;  %v1049_v4 = vadd.f32 %v1048_v0, %v986_v59  ;;  %v866_v57 = vld [vmem:[%s1816_s1 + $0x190] sm:$0xff]  ;;  %v1002_v59 = vmul.f32 %v865_v53, %v865_v53 }
 0x191   : > { %v915_v6 = vadd.f32 %v914_v2, %v851_v61  ;;  %v1050_v8 = vadd.f32 %v1049_v4, %v987_v63  ;;  %v867_v61 = vld [vmem:[%s1816_s1 + $0x198] sm:$0xff]  ;;  %v1003_v63 = vmul.f32 %v866_v57, %v866_v57 }
 0x193   : > { %v916_v10 = vadd.f32 %v915_v6, %v852_v1  ;;  %v1051_v12 = vadd.f32 %v1050_v8, %v988_v3  ;;  %v868_v1 = vld [vmem:[%s1816_s1 + $0x1a0] sm:$0xff]  ;;  %v1004_v3 = vmul.f32 %v867_v61, %v867_v61 }
 0x195   : > { %v917_v14 = vadd.f32 %v916_v10, %v853_v5  ;;  %v1052_v16 = vadd.f32 %v1051_v12, %v989_v7  ;;  %v869_v5 = vld [vmem:[%s1816_s1 + $0x1a8] sm:$0xff]  ;;  %v1005_v7 = vmul.f32 %v868_v1, %v868_v1 }
 0x197   : > { %v918_v18 = vadd.f32 %v917_v14, %v854_v9  ;;  %v1053_v20 = vadd.f32 %v1052_v16, %v990_v11  ;;  %v870_v9 = vld [vmem:[%s1816_s1 + $0x1b0] sm:$0xff]  ;;  %v1006_v11 = vmul.f32 %v869_v5, %v869_v5 }
 0x199   : > { %v919_v22 = vadd.f32 %v918_v18, %v855_v13  ;;  %v1054_v24 = vadd.f32 %v1053_v20, %v991_v15  ;;  %v871_v13 = vld [vmem:[%s1816_s1 + $0x1b8] sm:$0xff]  ;;  %v1007_v15 = vmul.f32 %v870_v9, %v870_v9 }
 0x19b   : > { %v920_v26 = vadd.f32 %v919_v22, %v856_v17  ;;  %v1055_v28 = vadd.f32 %v1054_v24, %v992_v19  ;;  %v872_v17 = vld [vmem:[%s1816_s1 + $0x1c0] sm:$0xff]  ;;  %v1008_v19 = vmul.f32 %v871_v13, %v871_v13 }
 0x19d   : > { %v921_v30 = vadd.f32 %v920_v26, %v857_v21  ;;  %v1056_v32 = vadd.f32 %v1055_v28, %v993_v23  ;;  %v873_v21 = vld [vmem:[%s1816_s1 + $0x1c8] sm:$0xff]  ;;  %v1009_v23 = vmul.f32 %v872_v17, %v872_v17 }
 0x19f   : > { %v922_v34 = vadd.f32 %v921_v30, %v858_v25  ;;  %v1057_v36 = vadd.f32 %v1056_v32, %v994_v27  ;;  %v874_v25 = vld [vmem:[%s1816_s1 + $0x1d0] sm:$0xff]  ;;  %v1010_v27 = vmul.f32 %v873_v21, %v873_v21 }
 0x1a1   : > { %v923_v38 = vadd.f32 %v922_v34, %v859_v29  ;;  %v1058_v40 = vadd.f32 %v1057_v36, %v995_v31  ;;  %v875_v29 = vld [vmem:[%s1816_s1 + $0x1d8] sm:$0xff]  ;;  %v1011_v31 = vmul.f32 %v874_v25, %v874_v25 }
 0x1a3   : > { %v924_v42 = vadd.f32 %v923_v38, %v860_v33  ;;  %v1059_v44 = vadd.f32 %v1058_v40, %v996_v35  ;;  %v876_v33 = vld [vmem:[%s1816_s1 + $0x1e0] sm:$0xff]  ;;  %v1012_v35 = vmul.f32 %v875_v29, %v875_v29 }
 0x1a5   : > { %v925_v46 = vadd.f32 %v924_v42, %v861_v37  ;;  %v1060_v48 = vadd.f32 %v1059_v44, %v997_v39  ;;  %v877_v37 = vld [vmem:[%s1816_s1 + $0x1e8] sm:$0xff]  ;;  %v1013_v39 = vmul.f32 %v876_v33, %v876_v33 }
 0x1a7   : > { %v926_v50 = vadd.f32 %v925_v46, %v862_v41  ;;  %v1061_v52 = vadd.f32 %v1060_v48, %v998_v43  ;;  %v878_v41 = vld [vmem:[%s1816_s1 + $0x1f0] sm:$0xff]  ;;  %v1014_v43 = vmul.f32 %v877_v37, %v877_v37 }
 0x1a9   : > { %v927_v54 = vadd.f32 %v926_v50, %v863_v45  ;;  %v1062_v56 = vadd.f32 %v1061_v52, %v999_v47  ;;  %v879_v45 = vld [vmem:[%s1816_s1 + $0x1f8] sm:$0xff]  ;;  %v1015_v47 = vmul.f32 %v878_v41, %v878_v41 }
 0x1aa   : > { %v1016_v50 = vmul.f32 %v879_v45, %v879_v45 }
 0x1ab   : > { %v928_v58 = vadd.f32 %v927_v54, %v864_v49  ;;  %v1063_v60 = vadd.f32 %v1062_v56, %v1000_v51 }
 0x1ad   : > { %v929_v62 = vadd.f32 %v928_v58, %v865_v53  ;;  %v1064_v0 = vadd.f32 %v1063_v60, %v1001_v55 }
 0x1af   : > { %v930_v2 = vadd.f32 %v929_v62, %v866_v57  ;;  %v1065_v4 = vadd.f32 %v1064_v0, %v1002_v59 }
 0x1b1   : > { %v931_v6 = vadd.f32 %v930_v2, %v867_v61  ;;  %v1066_v8 = vadd.f32 %v1065_v4, %v1003_v63  ;;  %v880_v63 = vld [vmem:[#allocation8] sm:$0x1]  ;;  %v952_v4 = vld [vmem:[#allocation10] sm:$0x1] }
 0x1b3   : > { %v932_v10 = vadd.f32 %v931_v6, %v868_v1  ;;  %v1067_v12 = vadd.f32 %v1066_v8, %v1004_v3 }
 0x1b5   : > { %v933_v14 = vadd.f32 %v932_v10, %v869_v5  ;;  %v1068_v16 = vadd.f32 %v1067_v12, %v1005_v7 }
 0x1b7   : > { %v934_v18 = vadd.f32 %v933_v14, %v870_v9  ;;  %v1069_v20 = vadd.f32 %v1068_v16, %v1006_v11 }
 0x1b9   : > { %v935_v22 = vadd.f32 %v934_v18, %v871_v13  ;;  %v1070_v24 = vadd.f32 %v1069_v20, %v1007_v15 }
 0x1bb   : > { %v936_v26 = vadd.f32 %v935_v22, %v872_v17  ;;  %v1071_v28 = vadd.f32 %v1070_v24, %v1008_v19 }
 0x1bd   : > { %v937_v30 = vadd.f32 %v936_v26, %v873_v21  ;;  %v1072_v32 = vadd.f32 %v1071_v28, %v1009_v23 }
 0x1bf   : > { %v938_v34 = vadd.f32 %v937_v30, %v874_v25  ;;  %v1073_v36 = vadd.f32 %v1072_v32, %v1010_v27 }
 0x1c1   : > { %v939_v38 = vadd.f32 %v938_v34, %v875_v29  ;;  %v1074_v40 = vadd.f32 %v1073_v36, %v1011_v31 }
 0x1c3   : > { %v940_v42 = vadd.f32 %v939_v38, %v876_v33  ;;  %v1075_v44 = vadd.f32 %v1074_v40, %v1012_v35 }
 0x1c5   : > { %v941_v46 = vadd.f32 %v940_v42, %v877_v37  ;;  %v1076_v48 = vadd.f32 %v1075_v44, %v1013_v39 }
 0x1c7   : > { %v942_v49 = vadd.f32 %v941_v46, %v878_v41  ;;  %v1077_v51 = vadd.f32 %v1076_v48, %v1014_v43 }
 0x1c9   : > { %v943_v52 = vadd.f32 %v942_v49, %v879_v45  ;;  %v1078_v53 = vadd.f32 %v1077_v51, %v1015_v47 }
 0x1cb   : > { %v944_v54 = vrot.slane %v943_v52, 4  ;;  %v1079_v55 = vadd.f32 %v1078_v53, %v1016_v50 }
 0x1cd   : > { %v945_v56 = vadd.f32 %v944_v54, %v943_v52  ;;  %v1080_v57 = vrot.slane %v1079_v55, 4 }
 0x1cf   : > { %v946_v58 = vrot.slane %v945_v56, 2  ;;  %v1081_v59 = vadd.f32 %v1080_v57, %v1079_v55 }
 0x1d1   : > { %v947_v60 = vadd.f32 %v946_v58, %v945_v56  ;;  %v1082_v61 = vrot.slane %v1081_v59, 2 }
 0x1d3   : > { %v948_v62 = vrot.slane %v947_v60, 1  ;;  %v1083_v0 = vadd.f32 %v1082_v61, %v1081_v59 }
 0x1d5   : > { %v949_v1 = vadd.f32 %v948_v62, %v947_v60  ;;  %v1084_v2 = vrot.slane %v1083_v0, 1 }
 0x1d7   : > { %v950_v3 = vadd.f32 %v949_v1, %v880_v63  ;;  %v1085_v5 = vadd.f32 %v1084_v2, %v1083_v0 }
 0x1d9   : > { %951 = vst [vmem:[#allocation8] sm:$0x1] %v950_v3  ;;  %v1086_v6 = vadd.f32 %v1085_v5, %v952_v4 }
 0x1da   : > { %1303 = dma.vmem_to_hbm [thread:$0]  (%p1667_p2), %s1117_s21, 16, %s1119_s20, [#allocation9]  }
 0x1db   : > { %1087 = vst [vmem:[#allocation10] sm:$0x1] %v1086_v6 }
 0x1dc   : > { %1305 = dma.vmem_to_hbm [thread:$0]  (%p1667_p2), %s1129_s25, 16, %s1131_s8, [#allocation9]  }
 0x1dd   : > { %1565 = dma.done.wait (%p1667_p2), [#allocation9], 32  }
 0x1de   : > { %1567 = vsyncadd (%p1667_p2), [#allocation9], 4294967264 }
 0x1df PF: > { %s2028_s18 = sld [smem:[#allocation15_spill]]  ;;  %s1152_s9 = sand.u32 1, %s1574_s15  }
 0x1e0   : > { %p1320_p5 = pnand %p1250_p11, %p1678_p6  ;;  %s1153_s14 = scalar_lea.sflag [#allocation4], %s1152_s9 }
 0x1e2   : > { %p1321_p9 = pneg %p1320_p5 }
 0x1e4   : > { %1569 = dma.done.wait (%p1321_p9), %s1153_s14, 8192  }
 0x1e5   : > { %1571 = vsyncadd (%p1321_p9), %s1153_s14, 4294959104  ;;  %s23_s20 = sadd.s32 1, %s2028_s18   ;;  %s2029_s24 = sld [smem:[#allocation16_spill]] }
 0x1e6   : > { %p20_p10 = scmp.ge.s32.totalorder %s23_s20, 4   ;;  %s2030_s15 = smov %s1578_s16 }
 0x1e7   : > { %s2031_s16 = smov %s1582_s17  ;;  %s2032_s17 = smov %s1720_s22 }
 0x1e8   : > { %s2033_s18 = smov %s1590_s19  ;;  %22 = sbr.rel (!%p20_p10) target bundleno = 10 (0xa), region = 106 }
 0x1eb   : > { %s2034_s19 = smov %s2029_s24 }
 0x1ed   :  { %1159 = vsyncpa [#allocation3], 1 }
 0x1ee   :  { %1161 = vsyncpa [#allocation3 + $0x1], 1 }
 0x1ef   :  { %1162 = vsyncpa [#allocation6], 1 }
 0x1f0   :  { %1163 = vsyncpa [#allocation4], 1 }
 0x1f1   :  { %1165 = vsyncpa [#allocation4 + $0x1], 1 }
 0x1f2   :  { %1166 = vsyncpa [#allocation9], 1 }

</bundles_post_ra>
